<compile_context>
chip_gen: v5e
topology: v5e:2x2
jax: 0.10.0
libtpu: 0.0.40
codegen_flags: <defaults>
</compile_context>

<pallas_src>
import functools
import math

import jax
import jax.numpy as jnp
import numpy as np
from jax.experimental import pallas as pl
from jax.experimental.pallas import tpu as pltpu


def gcn_attention_kernel(x_ref, adj_ref, w_ref, b_ref,
                         wq_ref, bq_ref, wk_ref, bk_ref, wv_ref, bv_ref,
                         wout_ref, bout_ref,
                         rexp_ref, hmask_ref, hsum_ref, hbcast_ref, amask_ref,
                         o_ref, *, scale):
    """Whole batch in one invocation.  M = B*N rows, heads live on the lane axis."""
    f32 = jnp.float32
    bf16 = jnp.bfloat16

    # ---- GCN:  gcn = A_blockdiag @ (x @ W) + b                      (M, Fout) f32 ----
    support = jnp.dot(x_ref[...], w_ref[...], preferred_element_type=f32)
    gcn = jnp.dot(adj_ref[...], support, preferred_element_type=f32) + b_ref[...]

    # ---- Q, K, V with zero-padded head_dim (lane-aligned, head-interleaved) ----------
    q = jnp.dot(gcn, wq_ref[...], preferred_element_type=f32) + bq_ref[...]   # (M, H*dp)
    k = jnp.dot(gcn, wk_ref[...], preferred_element_type=f32) + bk_ref[...]
    v = jnp.dot(gcn, wv_ref[...], preferred_element_type=f32) + bv_ref[...]

    # ---- expand K/V to head-stacked rows: row (j*H + h) keeps only head-h of node j --
    # rexp / hmask are 0/1 selectors -> bf16 selection is exact; downstream matmuls are
    # bf16 anyway, so this is bit-compatible with an f32 selection + later cast.
    rexp = rexp_ref[...]                 # (M*H, M)    bf16 0/1 node replication
    hmask = hmask_ref[...]               # (M*H, H*dp) bf16 0/1 head selector
    kbig = jnp.dot(rexp, k.astype(bf16),
                   preferred_element_type=f32).astype(bf16) * hmask           # (M*H, H*dp)
    vbig = jnp.dot(rexp, v.astype(bf16),
                   preferred_element_type=f32).astype(bf16) * hmask

    # ---- all-head, all-pair scores in ONE matmul: dots[i, j*H + h] = <q_ih, k_jh> ----
    dots = jax.lax.dot_general(
        q.astype(bf16), kbig, (((1,), (1,)), ((), ())),
        preferred_element_type=f32) * scale                                   # (M, M*H)
    dots = dots + amask_ref[...]                  # -1e30 on cross-batch (i, j) pairs
    dots = dots - jnp.max(dots, axis=-1, keepdims=True)
    e = jnp.exp(dots).astype(bf16)                                            # (M, M*H)

    # ---- per-(node, head) softmax denominator and attn @ V, one matmul each ----------
    denom = jnp.dot(e, hsum_ref[...], preferred_element_type=f32)             # (M, H)
    ctx = jnp.dot(e, vbig, preferred_element_type=f32)                        # (M, H*dp)
    inv = pl.reciprocal(denom, approx=True)
    ctx = ctx * jnp.dot(inv, hbcast_ref[...], preferred_element_type=f32)     # 1/denom -> head lanes

    # ---- to_out projection fused over the padded head layout, then elementwise gate --
    # TODO(synk): Dropout(0.1) inside to_out is omitted (inference-only forward).
    aw = jnp.dot(ctx, wout_ref[...], preferred_element_type=f32) + bout_ref[...]  # (M, Fout)
    o_ref[...] = gcn * aw


def graph_convolution(x, adj, params, *, num_heads, head_dim, padded_head_dim=8):
    B, N, Fin = x.shape
    Fout = params["weight"].shape[1]
    H, d = num_heads, head_dim
    dp = max(padded_head_dim, head_dim)
    inner = H * d
    M = B * N

    # ---- host-side (one-off) re-layout: flatten batch, block-diagonal adjacency ------
    x_flat = x.reshape(M, Fin)
    adj_bd = jnp.kron(jnp.eye(B, dtype=adj.dtype), adj)                  # (M, M)

    # ---- split to_qkv into lane-aligned, per-head zero-padded wq / wk / wv -----------
    def pad_cols(wcols, bcols):
        wp = jnp.pad(wcols.reshape(Fout, H, d), ((0, 0), (0, 0), (0, dp - d)))
        bp = jnp.pad(bcols.reshape(1, H, d), ((0, 0), (0, 0), (0, dp - d)))
        return wp.reshape(Fout, H * dp), bp.reshape(1, H * dp)

    wqkv, bqkv = params["wqkv"], params["bqkv"]
    wq, bq = pad_cols(wqkv[:, 0 * inner:1 * inner], bqkv[:, 0 * inner:1 * inner])
    wk, bk = pad_cols(wqkv[:, 1 * inner:2 * inner], bqkv[:, 1 * inner:2 * inner])
    wv, bv = pad_cols(wqkv[:, 2 * inner:3 * inner], bqkv[:, 2 * inner:3 * inner])
    wout_p = jnp.pad(params["wout"].reshape(H, d, Fout),
                     ((0, 0), (0, dp - d), (0, 0))).reshape(H * dp, Fout)

    # ---- constant selector / mask matrices (tiny, built once on host) ----------------
    row = np.arange(M * H)
    j_of_row, h_of_row = row // H, row % H
    col_h = np.arange(H * dp) // dp
    rexp = (j_of_row[:, None] == np.arange(M)[None, :])                       # (M*H, M)
    hmask = (h_of_row[:, None] == col_h[None, :])                             # (M*H, H*dp)
    hsum = (h_of_row[:, None] == np.arange(H)[None, :])                       # (M*H, H)
    hbcast = (np.arange(H)[:, None] == col_h[None, :]).astype(np.float32)     # (H, H*dp)
    amask = np.where((np.arange(M) // N)[:, None] == (j_of_row // N)[None, :],
                     0.0, -1e30).astype(np.float32)                           # (M, M*H)

    kernel = functools.partial(gcn_attention_kernel, scale=d ** (-0.5))
    n_inputs = 17
    out = pl.pallas_call(                     # no grid: whole batch, one invocation
        kernel,
        out_shape=jax.ShapeDtypeStruct((M, Fout), jnp.float32),
        in_specs=[pl.BlockSpec(memory_space=pltpu.MemorySpace.VMEM)] * n_inputs,
        out_specs=pl.BlockSpec(memory_space=pltpu.MemorySpace.VMEM),
    )(x_flat, adj_bd, params["weight"], params["bias"],
      wq, bq, wk, bk, wv, bv, wout_p, params["bout"],
      jnp.asarray(rexp, jnp.bfloat16), jnp.asarray(hmask, jnp.bfloat16),
      jnp.asarray(hsum, jnp.bfloat16), jnp.asarray(hbcast), jnp.asarray(amask))

    return jnp.squeeze(out.reshape(B, N, Fout))   # matches torch .squeeze()


def reference(x, adj, p, *, num_heads, head_dim):
    """Pure-JAX reference reproducing the PyTorch forward."""
    with jax.default_matmul_precision("highest"):
        support = jnp.einsum("bnf,fo->bno", x, p["weight"])
        gcn = jnp.einsum("nm,bmo->bno", adj, support) + p["bias"]
        qkv = gcn @ p["wqkv"] + p["bqkv"]
        q, k, v = jnp.split(qkv, 3, axis=-1)

        def split_heads(t):
            B, N, _ = t.shape
            return t.reshape(B, N, num_heads, head_dim).transpose(0, 2, 1, 3)

        q, k, v = map(split_heads, (q, k, v))
        dots = jnp.einsum("bhid,bhjd->bhij", q, k) * head_dim ** (-0.5)
        attn = jax.nn.softmax(dots, axis=-1)
        out = jnp.einsum("bhij,bhjd->bhid", attn, v)
        B, H, N, D = out.shape
        out = out.transpose(0, 2, 1, 3).reshape(B, N, H * D)
        aw = out @ p["wout"] + p["bout"]
        return jnp.squeeze(gcn * aw)


def init_params(key, in_features, out_features, num_heads, head_dim):
    """Deterministic parameter init mirroring the module's shapes (weights pre-transposed)."""
    inner = num_heads * head_dim
    ks = jax.random.split(key, 6)
    stdv = 1.0 / math.sqrt(out_features)          # reset_parameters()
    qkv_bound = 1.0 / math.sqrt(out_features)     # nn.Linear default bound
    out_bound = 1.0 / math.sqrt(inner)
    u = lambda k, shape, b: jax.random.uniform(k, shape, jnp.float32, -b, b)
    return {
        "weight": u(ks[0], (in_features, out_features), stdv),
        "bias":   u(ks[1], (1, out_features), stdv),
        "wqkv":   u(ks[2], (out_features, 3 * inner), qkv_bound),
        "bqkv":   u(ks[3], (1, 3 * inner), qkv_bound),
        "wout":   u(ks[4], (inner, out_features), out_bound),
        "bout":   u(ks[5], (1, out_features), out_bound),
    }


if __name__ == "__main__":
    B, N, Fin, Fout = 2, 8, 16, 8          # Attention(dim=Fout, heads=Fout, head_dim=3)
    num_heads, head_dim = Fout, 3

    key = jax.random.PRNGKey(0)
    kx, kadj, kp = jax.random.split(key, 3)
    x = jax.random.normal(kx, (B, N, Fin), jnp.float32)
    adj = jax.random.uniform(kadj, (N, N), jnp.float32)
    adj = adj / jnp.sum(adj, axis=-1, keepdims=True)   # row-normalized adjacency

    params = init_params(kp, Fin, Fout, num_heads, head_dim)

    out = graph_convolution(x, adj, params, num_heads=num_heads, head_dim=head_dim)
    out = jax.block_until_ready(out)

    ref = jax.block_until_ready(
        reference(x, adj, params, num_heads=num_heads, head_dim=head_dim))

    assert out.shape == ref.shape, (out.shape, ref.shape)
    np.testing.assert_allclose(np.asarray(out), np.asarray(ref),
                               rtol=1e-2, atol=2e-3)
    print("KERNEL_OK")
</pallas_src>

<mosaic_0001>
module attributes {stable_mosaic.version = 11 : i64} {
  func.func @gcn_attention_kernel(%arg0: memref<16x16xf32, #tpu.memory_space<vmem>>, %arg1: memref<16x16xf32, #tpu.memory_space<vmem>>, %arg2: memref<16x8xf32, #tpu.memory_space<vmem>>, %arg3: memref<1x8xf32, #tpu.memory_space<vmem>>, %arg4: memref<8x64xf32, #tpu.memory_space<vmem>>, %arg5: memref<1x64xf32, #tpu.memory_space<vmem>>, %arg6: memref<8x64xf32, #tpu.memory_space<vmem>>, %arg7: memref<1x64xf32, #tpu.memory_space<vmem>>, %arg8: memref<8x64xf32, #tpu.memory_space<vmem>>, %arg9: memref<1x64xf32, #tpu.memory_space<vmem>>, %arg10: memref<64x8xf32, #tpu.memory_space<vmem>>, %arg11: memref<1x8xf32, #tpu.memory_space<vmem>>, %arg12: memref<128x16xbf16, #tpu.memory_space<vmem>>, %arg13: memref<128x64xbf16, #tpu.memory_space<vmem>>, %arg14: memref<128x8xbf16, #tpu.memory_space<vmem>>, %arg15: memref<8x64xf32, #tpu.memory_space<vmem>>, %arg16: memref<16x128xf32, #tpu.memory_space<vmem>>, %arg17: memref<16x8xf32, #tpu.memory_space<vmem>>) attributes {dimension_semantics = [], scalar_prefetch = 0 : i64, scratch_operands = 0 : i64, tpu.core_type = #tpu.core_type<tc>} {
    %c0 = arith.constant 0 : index
    %c0_0 = arith.constant 0 : index
    %0 = vector.load %arg0[%c0, %c0_0] : memref<16x16xf32, #tpu.memory_space<vmem>>, vector<16x16xf32>
    %c0_1 = arith.constant 0 : index
    %c0_2 = arith.constant 0 : index
    %1 = vector.load %arg2[%c0_1, %c0_2] : memref<16x8xf32, #tpu.memory_space<vmem>>, vector<16x8xf32>
    %cst = arith.constant dense<0.000000e+00> : vector<16x8xf32>
    %2 = tpu.matmul %0, %1, %cst {dimension_numbers = #tpu.dot_dimension_numbers<[1], [0], [0], [1], [0, 0, 1, 1], [], []>} : vector<16x16xf32>, vector<16x8xf32>, vector<16x8xf32> -> vector<16x8xf32>
    %c0_3 = arith.constant 0 : index
    %c0_4 = arith.constant 0 : index
    %3 = vector.load %arg1[%c0_3, %c0_4] : memref<16x16xf32, #tpu.memory_space<vmem>>, vector<16x16xf32>
    %cst_5 = arith.constant dense<0.000000e+00> : vector<16x8xf32>
    %4 = tpu.matmul %3, %2, %cst_5 {dimension_numbers = #tpu.dot_dimension_numbers<[1], [0], [0], [1], [0, 0, 1, 1], [], []>} : vector<16x16xf32>, vector<16x8xf32>, vector<16x8xf32> -> vector<16x8xf32>
    %c0_6 = arith.constant 0 : index
    %c0_7 = arith.constant 0 : index
    %5 = vector.load %arg3[%c0_6, %c0_7] : memref<1x8xf32, #tpu.memory_space<vmem>>, vector<1x8xf32>
    %6 = vector.broadcast %5 : vector<1x8xf32> to vector<16x8xf32>
    %7 = arith.addf %4, %6 : vector<16x8xf32>
    %c0_8 = arith.constant 0 : index
    %c0_9 = arith.constant 0 : index
    %8 = vector.load %arg4[%c0_8, %c0_9] : memref<8x64xf32, #tpu.memory_space<vmem>>, vector<8x64xf32>
    %cst_10 = arith.constant dense<0.000000e+00> : vector<16x64xf32>
    %9 = tpu.matmul %7, %8, %cst_10 {dimension_numbers = #tpu.dot_dimension_numbers<[1], [0], [0], [1], [0, 0, 1, 1], [], []>} : vector<16x8xf32>, vector<8x64xf32>, vector<16x64xf32> -> vector<16x64xf32>
    %c0_11 = arith.constant 0 : index
    %c0_12 = arith.constant 0 : index
    %10 = vector.load %arg5[%c0_11, %c0_12] : memref<1x64xf32, #tpu.memory_space<vmem>>, vector<1x64xf32>
    %11 = vector.broadcast %10 : vector<1x64xf32> to vector<16x64xf32>
    %12 = arith.addf %9, %11 : vector<16x64xf32>
    %c0_13 = arith.constant 0 : index
    %c0_14 = arith.constant 0 : index
    %13 = vector.load %arg6[%c0_13, %c0_14] : memref<8x64xf32, #tpu.memory_space<vmem>>, vector<8x64xf32>
    %cst_15 = arith.constant dense<0.000000e+00> : vector<16x64xf32>
    %14 = tpu.matmul %7, %13, %cst_15 {dimension_numbers = #tpu.dot_dimension_numbers<[1], [0], [0], [1], [0, 0, 1, 1], [], []>} : vector<16x8xf32>, vector<8x64xf32>, vector<16x64xf32> -> vector<16x64xf32>
    %c0_16 = arith.constant 0 : index
    %c0_17 = arith.constant 0 : index
    %15 = vector.load %arg7[%c0_16, %c0_17] : memref<1x64xf32, #tpu.memory_space<vmem>>, vector<1x64xf32>
    %16 = vector.broadcast %15 : vector<1x64xf32> to vector<16x64xf32>
    %17 = arith.addf %14, %16 : vector<16x64xf32>
    %c0_18 = arith.constant 0 : index
    %c0_19 = arith.constant 0 : index
    %18 = vector.load %arg8[%c0_18, %c0_19] : memref<8x64xf32, #tpu.memory_space<vmem>>, vector<8x64xf32>
    %cst_20 = arith.constant dense<0.000000e+00> : vector<16x64xf32>
    %19 = tpu.matmul %7, %18, %cst_20 {dimension_numbers = #tpu.dot_dimension_numbers<[1], [0], [0], [1], [0, 0, 1, 1], [], []>} : vector<16x8xf32>, vector<8x64xf32>, vector<16x64xf32> -> vector<16x64xf32>
    %c0_21 = arith.constant 0 : index
    %c0_22 = arith.constant 0 : index
    %20 = vector.load %arg9[%c0_21, %c0_22] : memref<1x64xf32, #tpu.memory_space<vmem>>, vector<1x64xf32>
    %21 = vector.broadcast %20 : vector<1x64xf32> to vector<16x64xf32>
    %22 = arith.addf %19, %21 : vector<16x64xf32>
    %c0_23 = arith.constant 0 : index
    %c0_24 = arith.constant 0 : index
    %23 = vector.load %arg12[%c0_23, %c0_24] : memref<128x16xbf16, #tpu.memory_space<vmem>>, vector<128x16xbf16>
    %c0_25 = arith.constant 0 : index
    %c0_26 = arith.constant 0 : index
    %24 = vector.load %arg13[%c0_25, %c0_26] : memref<128x64xbf16, #tpu.memory_space<vmem>>, vector<128x64xbf16>
    %25 = arith.truncf %17 : vector<16x64xf32> to vector<16x64xbf16>
    %cst_27 = arith.constant dense<0.000000e+00> : vector<128x64xf32>
    %26 = tpu.matmul %23, %25, %cst_27 {dimension_numbers = #tpu.dot_dimension_numbers<[1], [0], [0], [1], [0, 0, 1, 1], [], []>} : vector<128x16xbf16>, vector<16x64xbf16>, vector<128x64xf32> -> vector<128x64xf32>
    %27 = arith.truncf %26 : vector<128x64xf32> to vector<128x64xbf16>
    %28 = arith.mulf %27, %24 : vector<128x64xbf16>
    %29 = arith.truncf %22 : vector<16x64xf32> to vector<16x64xbf16>
    %cst_28 = arith.constant dense<0.000000e+00> : vector<128x64xf32>
    %30 = tpu.matmul %23, %29, %cst_28 {dimension_numbers = #tpu.dot_dimension_numbers<[1], [0], [0], [1], [0, 0, 1, 1], [], []>} : vector<128x16xbf16>, vector<16x64xbf16>, vector<128x64xf32> -> vector<128x64xf32>
    %31 = arith.truncf %30 : vector<128x64xf32> to vector<128x64xbf16>
    %32 = arith.mulf %31, %24 : vector<128x64xbf16>
    %33 = arith.truncf %12 : vector<16x64xf32> to vector<16x64xbf16>
    %cst_29 = arith.constant dense<0.000000e+00> : vector<16x128xf32>
    %34 = tpu.matmul %33, %28, %cst_29 {dimension_numbers = #tpu.dot_dimension_numbers<[1], [1], [0], [0], [0, 0, 1, 0], [], []>} : vector<16x64xbf16>, vector<128x64xbf16>, vector<16x128xf32> -> vector<16x128xf32>
    %cst_30 = arith.constant 0.577350259 : f32
    %35 = vector.broadcast %cst_30 : f32 to vector<16x128xf32>
    %36 = arith.mulf %34, %35 : vector<16x128xf32>
    %c0_31 = arith.constant 0 : index
    %c0_32 = arith.constant 0 : index
    %37 = vector.load %arg16[%c0_31, %c0_32] : memref<16x128xf32, #tpu.memory_space<vmem>>, vector<16x128xf32>
    %38 = arith.addf %36, %37 : vector<16x128xf32>
    %cst_33 = arith.constant dense<0xFF800000> : vector<16xf32>
    %39 = vector.multi_reduction <maximumf>, %38, %cst_33 [1] : vector<16x128xf32> to vector<16xf32>
    %40 = vector.shape_cast %39 : vector<16xf32> to vector<16x1xf32>
    %41 = vector.broadcast %40 : vector<16x1xf32> to vector<16x128xf32>
    %42 = arith.subf %38, %41 : vector<16x128xf32>
    %43 = math.exp %42 : vector<16x128xf32>
    %44 = arith.truncf %43 : vector<16x128xf32> to vector<16x128xbf16>
    %c0_34 = arith.constant 0 : index
    %c0_35 = arith.constant 0 : index
    %45 = vector.load %arg14[%c0_34, %c0_35] : memref<128x8xbf16, #tpu.memory_space<vmem>>, vector<128x8xbf16>
    %cst_36 = arith.constant dense<0.000000e+00> : vector<16x8xf32>
    %46 = tpu.matmul %44, %45, %cst_36 {dimension_numbers = #tpu.dot_dimension_numbers<[1], [0], [0], [1], [0, 0, 1, 1], [], []>} : vector<16x128xbf16>, vector<128x8xbf16>, vector<16x8xf32> -> vector<16x8xf32>
    %cst_37 = arith.constant dense<0.000000e+00> : vector<16x64xf32>
    %47 = tpu.matmul %44, %32, %cst_37 {dimension_numbers = #tpu.dot_dimension_numbers<[1], [0], [0], [1], [0, 0, 1, 1], [], []>} : vector<16x128xbf16>, vector<128x64xbf16>, vector<16x64xf32> -> vector<16x64xf32>
    %48 = tpu.reciprocal %46 {approx = true} : vector<16x8xf32> -> vector<16x8xf32>
    %c0_38 = arith.constant 0 : index
    %c0_39 = arith.constant 0 : index
    %49 = vector.load %arg15[%c0_38, %c0_39] : memref<8x64xf32, #tpu.memory_space<vmem>>, vector<8x64xf32>
    %cst_40 = arith.constant dense<0.000000e+00> : vector<16x64xf32>
    %50 = tpu.matmul %48, %49, %cst_40 {dimension_numbers = #tpu.dot_dimension_numbers<[1], [0], [0], [1], [0, 0, 1, 1], [], []>} : vector<16x8xf32>, vector<8x64xf32>, vector<16x64xf32> -> vector<16x64xf32>
    %51 = arith.mulf %47, %50 : vector<16x64xf32>
    %c0_41 = arith.constant 0 : index
    %c0_42 = arith.constant 0 : index
    %52 = vector.load %arg10[%c0_41, %c0_42] : memref<64x8xf32, #tpu.memory_space<vmem>>, vector<64x8xf32>
    %cst_43 = arith.constant dense<0.000000e+00> : vector<16x8xf32>
    %53 = tpu.matmul %51, %52, %cst_43 {dimension_numbers = #tpu.dot_dimension_numbers<[1], [0], [0], [1], [0, 0, 1, 1], [], []>} : vector<16x64xf32>, vector<64x8xf32>, vector<16x8xf32> -> vector<16x8xf32>
    %c0_44 = arith.constant 0 : index
    %c0_45 = arith.constant 0 : index
    %54 = vector.load %arg11[%c0_44, %c0_45] : memref<1x8xf32, #tpu.memory_space<vmem>>, vector<1x8xf32>
    %55 = vector.broadcast %54 : vector<1x8xf32> to vector<16x8xf32>
    %56 = arith.addf %53, %55 : vector<16x8xf32>
    %57 = arith.mulf %7, %56 : vector<16x8xf32>
    %c0_46 = arith.constant 0 : index
    %c0_47 = arith.constant 0 : index
    %58 = vector.load %arg17[%c0_46, %c0_47] : memref<16x8xf32, #tpu.memory_space<vmem>>, vector<16x8xf32>
    tpu.vector_store %arg17[%c0_46, %c0_47], %57 {strides = array<i32>} : memref<16x8xf32, #tpu.memory_space<vmem>>, vector<16x8xf32>,
    return
  }
}

</mosaic_0001>

<bundles_post_ra>
// kernel: tpu_custom_call.1
= control target key start
LH: loop header
LB: loop body
LE: loop exit
PB: predicated region body
PF: predicated region fallthrough
CT: control target
= control target key end

     0   :  { %vm61_vm0 = vcmask 130048   ;;  %vm131_vm1 = vcmask 64512   ;;  %vm542_vm2 = vcmask 523264   ;;  %s1407_s2 = inlined_call_operand.vmem [shape: f32[16,8], index: 2, kind: input, shape index: {}]   ;;  %s1408_s0 = inlined_call_operand.vmem [shape: f32[16,16], index: 0, kind: input, shape index: {}]   ;;  %s1409_s3 = inlined_call_operand.vmem [shape: f32[1,8], index: 3, kind: input, shape index: {}]   ;;  %s1410_s1 = inlined_call_operand.vmem [shape: f32[16,16], index: 1, kind: input, shape index: {}]   ;;  %s1411_s5 = inlined_call_operand.vmem [shape: f32[1,64], index: 5, kind: input, shape index: {}]   ;;  %s1412_s4 = inlined_call_operand.vmem [shape: f32[8,64], index: 4, kind: input, shape index: {}]   ;;  %s1413_s6 = inlined_call_operand.vmem [shape: f32[8,64], index: 6, kind: input, shape index: {}]   ;;  %s1414_s8 = inlined_call_operand.vmem [shape: f32[8,64], index: 8, kind: input, shape index: {}]   ;;  %s1415_s7 = inlined_call_operand.vmem [shape: f32[1,64], index: 7, kind: input, shape index: {}]   ;;  %s1416_s9 = inlined_call_operand.vmem [shape: f32[1,64], index: 9, kind: input, shape index: {}]   ;;  %s1417_s12 = inlined_call_operand.vmem [shape: bf16[128,16], index: 12, kind: input, shape index: {}]   ;;  %s1418_s13 = inlined_call_operand.vmem [shape: bf16[128,64], index: 13, kind: input, shape index: {}]   ;;  %s1419_s16 = inlined_call_operand.vmem [shape: f32[16,128], index: 16, kind: input, shape index: {}]   ;;  %s1420_s14 = inlined_call_operand.vmem [shape: bf16[128,8], index: 14, kind: input, shape index: {}]   ;;  %s1421_s15 = inlined_call_operand.vmem [shape: f32[8,64], index: 15, kind: input, shape index: {}]   ;;  %s1422_s10 = inlined_call_operand.vmem [shape: f32[64,8], index: 10, kind: input, shape index: {}]   ;;  %s1423_s11 = inlined_call_operand.vmem [shape: f32[1,8], index: 11, kind: input, shape index: {}]   ;;  %s1424_s17 = inlined_call_operand.vmem [shape: f32[16,8], index: 17, kind: output, shape index: {}]  }
   0x1   :  { %1427 = sst [smem:[#allocation2_spill]] %s1407_s2  ;;  %v91_v6 = vld [vmem:[%s1410_s1] sm:$0xff]  ;;  %v92_v7 = vld [vmem:[%s1410_s1 + $0x8] sm:$0xff]  ;;  %v873_v36 = vld [vmem:[%s1417_s12 + $0x10] sm:$0xff] }
   0x2   :  { %1428 = sst [smem:[#allocation3_spill]] %s1408_s0  ;;  %v126_v8 = vld [vmem:[%s1412_s4] sm:$0xff]  ;;  %v872_v35 = vld [vmem:[%s1417_s12 + $0x8] sm:$0xff]  ;;  %v874_v37 = vld [vmem:[%s1417_s12 + $0x18] sm:$0xff] }
   0x3   :  { %s1429_s26 = sld [smem:[#allocation2_spill]]  ;;  %153 = vmatpush.msra.mxu2 %v126_v8  ;;  %v161_v9 = vld [vmem:[%s1413_s6] sm:$0xff]  ;;  %v876_v39 = vld [vmem:[%s1417_s12 + $0x28] sm:$0xff]  ;;  %v877_v40 = vld [vmem:[%s1417_s12 + $0x30] sm:$0xff] }
   0x4   :  { %s1430_s30 = sld [smem:[#allocation3_spill]]  ;;  %v926_v10 = vld [vmem:[%s1409_s3] ss:$0 sm:$0xff]  ;;  %v878_v41 = vld [vmem:[%s1417_s12 + $0x38] sm:$0xff]  ;;  %v1154_v56 = vld [vmem:[%s1418_s13 + $0x8] sm:$0xff]  }
   0x5   :  { %181 = vmatpush.msrb.mxu2 %v161_v9  ;;  %v189_v13 = vld [vmem:[%s1414_s8] sm:$0xff]  ;;  %v893_v58 = vunpack.c.l.bf16 %v1154_v56  ;;  %v894_v60 = vunpack.c.h.bf16 %v1154_v56 }
   0x6   :  { %v927_v17 = vld [vmem:[%s1411_s5] ss:$0 sm:$0xff] }
   0x7   :  { %v928_v23 = vld [vmem:[%s1415_s7] ss:$0 sm:$0xff] }
   0x8   :  { %v871_v28 = vld [vmem:[%s1417_s12] sm:$0xff] }
   0x9   :  { %v60_v0 = vld [vmem:[%s1429_s26 + $0x8] sm:$0xff]  ;;  %v59_v1 = vld [vmem:[%s1429_s26] sm:$0xff] }
   0xa   :  { %82 = vmatpush.msra.mxu1 %v60_v0  ;;  %v57_v2 = vld [vmem:[%s1430_s30] sm:$0xff]  ;;  %v58_v3 = vld [vmem:[%s1430_s30 + $0x8] sm:$0xff] }
   0xb   :  { %v929_v30 = vld [vmem:[%s1416_s9] ss:$0 sm:$0xff] }
   0xc   :  { %83 = vmatpush.msra.mxu1 %v59_v1  ;;  %v875_v38 = vld [vmem:[%s1417_s12 + $0x20] sm:$0xff] }
   0xd   :  { %776 = vmatmul.msk.f32.vlgmr.msra.gmra.mxu1 %vm61_vm0, %v57_v2  ;;  %v1137_v44 = vld [vmem:[%s1418_s13] sm:$0xff]  }
   0xe   :  { %v889_v46 = vunpack.c.l.bf16 %v1137_v44  ;;  %v890_v48 = vunpack.c.h.bf16 %v1137_v44  ;;  %v695_v44 = vld [vmem:[%s1421_s15] sm:$0xff] }
  0x15   :  { %777 = vmatmul.msk.f32.gmra.mxu1 %vm61_vm0, %v58_v3 }
  0x8a   :  { %v85_v4 = vpop.f32.mrf.mxu1 }
  0x92   :  { %v88_v5 = vpop.f32.mrf.mxu1 }
  0x93   :  { %117 = vmatpush.msrb.mxu1 %v88_v5 }
  0x95   :  { %118 = vmatpush.msrb.mxu1 %v85_v4  ;;  %v1171_v4 = vld [vmem:[%s1418_s13 + $0x10] sm:$0xff]  }
  0x96   :  { %778 = vmatmul.msk.f32.vlgmr.msrb.gmra.mxu1 %vm61_vm0, %v91_v6  ;;  %v897_v6 = vunpack.c.l.bf16 %v1171_v4  ;;  %v898_v8 = vunpack.c.h.bf16 %v1171_v4 }
  0x9e   :  { %779 = vmatmul.msk.f32.gmra.mxu1 %vm61_vm0, %v92_v7 }
 0x113   :  { %v120_v11 = vpop.f32.mrf.mxu1 }
 0x114   :  { %v1060_v12 = vadd.f32 %v926_v10, %v120_v11 }
 0x116   :  { %780 = vmatmul.msk.f32.vlgmr.msra.gmra.mxu2 %vm131_vm1, %v1060_v12 }
 0x117   :  { %209 = vmatpush.msra.mxu2 %v189_v13 }
 0x11b   :  { %v123_v14 = vpop.f32.mrf.mxu1 }
 0x11c   :  { %v1067_v15 = vadd.f32 %v926_v10, %v123_v14 }
 0x11e   :  { %781 = vmatmul.msk.f32.gmra.mxu2 %vm131_vm1, %v1067_v15 }
 0x126   :  { %782 = vmatmul.msk.f32.vlgmr.msrb.gmra.mxu2 %vm131_vm1, %v1060_v12 }
 0x12e   :  { %783 = vmatmul.msk.f32.gmra.mxu2 %vm131_vm1, %v1067_v15 }
 0x136   :  { %784 = vmatmul.msk.f32.vlgmr.msra.gmra.mxu2 %vm131_vm1, %v1060_v12 }
 0x13e   :  { %785 = vmatmul.msk.f32.gmra.mxu2 %vm131_vm1, %v1067_v15 }
 0x199   :  { %v155_v16 = vpop.f32.mrf.mxu2 }
 0x19a   :  { %v1082_v19 = vadd.f32 %v927_v17, %v155_v16 }
 0x1a1   :  { %v158_v18 = vpop.f32.mrf.mxu2 }
 0x1a2   :  { %v1084_v20 = vadd.f32 %v927_v17, %v158_v18  ;;  %v1188_v18 = vld [vmem:[%s1418_s13 + $0x18] sm:$0xff]  }
 0x1a4   :  { %v541_v21 = vpack.c.bf16 %v1084_v20, %v1082_v19  ;;  %v586_v20 = vld [vmem:[%s1419_s16] sm:$0xff] }
 0x1a9   :  { %v183_v22 = vpop.f32.mrf.mxu2 }
 0x1aa   :  { %v184_v25 = vadd.f32 %v928_v23, %v183_v22 }
 0x1b1   :  { %v186_v24 = vpop.f32.mrf.mxu2 }
 0x1b2   :  { %v187_v26 = vadd.f32 %v928_v23, %v186_v24  ;;  %v901_v23 = vunpack.c.l.bf16 %v1188_v18 }
 0x1b4   :  { %v249_v27 = vpack.c.bf16 %v187_v26, %v184_v25  ;;  %v902_v25 = vunpack.c.h.bf16 %v1188_v18 }
 0x1b6   :  { %321 = vmatpush.bf16.msra.mxu3 %v249_v27 }
 0x1b9   :  { %v211_v29 = vpop.f32.mrf.mxu2  ;;  %818 = vmatmul.msk.bf16.vlgmr.msra.gmra.mxu3 %vm61_vm0, %v871_v28 }
 0x1ba   :  { %v212_v32 = vadd.f32 %v929_v30, %v211_v29 }
 0x1c1   :  { %v214_v31 = vpop.f32.mrf.mxu2 }
 0x1c2   :  { %v215_v33 = vadd.f32 %v929_v30, %v214_v31 }
 0x1c4   :  { %v435_v34 = vpack.c.bf16 %v215_v33, %v212_v32  ;;  %v1199_v33 = vld [vmem:[%s1418_s13 + $0x20] sm:$0xff]  }
 0x1c6   :  { %443 = vmatpush.bf16.msra.mxu0 %v435_v34 }
 0x1c9   :  { %819 = vmatmul.msk.bf16.gmra.mxu3 %vm61_vm0, %v872_v35  ;;  %826 = vmatmul.msk.bf16.vlgmr.msra.gmra.mxu0 %vm61_vm0, %v871_v28 }
 0x1d9   :  { %820 = vmatmul.msk.bf16.gmra.mxu3 %vm61_vm0, %v873_v36  ;;  %827 = vmatmul.msk.bf16.gmra.mxu0 %vm61_vm0, %v872_v35  ;;  %v905_v35 = vunpack.c.l.bf16 %v1199_v33 }
 0x1e9   :  { %821 = vmatmul.msk.bf16.gmra.mxu3 %vm61_vm0, %v874_v37  ;;  %828 = vmatmul.msk.bf16.gmra.mxu0 %vm61_vm0, %v873_v36 }
 0x1f9   :  { %822 = vmatmul.msk.bf16.gmra.mxu3 %vm61_vm0, %v875_v38  ;;  %829 = vmatmul.msk.bf16.gmra.mxu0 %vm61_vm0, %v874_v37  ;;  %v906_v37 = vunpack.c.h.bf16 %v1199_v33 }
 0x209   :  { %823 = vmatmul.msk.bf16.gmra.mxu3 %vm61_vm0, %v876_v39  ;;  %830 = vmatmul.msk.bf16.gmra.mxu0 %vm61_vm0, %v875_v38 }
 0x219   :  { %824 = vmatmul.msk.bf16.gmra.mxu3 %vm61_vm0, %v877_v40  ;;  %831 = vmatmul.msk.bf16.gmra.mxu0 %vm61_vm0, %v876_v39 }
 0x229   :  { %825 = vmatmul.msk.bf16.gmra.mxu3 %vm61_vm0, %v878_v41  ;;  %832 = vmatmul.msk.bf16.gmra.mxu0 %vm61_vm0, %v877_v40 }
 0x239   :  { %833 = vmatmul.msk.bf16.gmra.mxu0 %vm61_vm0, %v878_v41 }
 0x23c   :  { %v323_v42 = vpop.f32.mrf.mxu3 }
 0x23d   :  { %v363_v43 = vpack.c.bf16 %v323_v42, %v323_v42 }
 0x23f   :  { %v379_v47 = vunpack.c.l.bf16 %v363_v43 }
 0x241   :  { %v1143_v51 = vmul.f32 %v889_v46, %v379_v47 }
 0x244   :  { %v325_v45 = vpop.f32.mrf.mxu3 }
 0x245   :  { %v364_v49 = vpack.c.bf16 %v325_v45, %v325_v45 }
 0x247   :  { %v380_v50 = vunpack.c.l.bf16 %v364_v49 }
 0x249   :  { %v1147_v52 = vmul.f32 %v890_v48, %v380_v50 }
 0x24b   :  { %v427_v53 = vpack.c.bf16 %v1147_v52, %v1143_v51 }
 0x24c   :  { %v328_v54 = vpop.f32.mrf.mxu3 }
 0x24d   :  { %v365_v55 = vpack.c.bf16 %v328_v54, %v328_v54  ;;  %v1210_v54 = vld [vmem:[%s1418_s13 + $0x38] sm:$0xff]  }
 0x24f   :  { %v381_v59 = vunpack.c.l.bf16 %v365_v55 }
 0x251   :  { %v1160_v63 = vmul.f32 %v893_v58, %v381_v59 }
 0x254   :  { %v330_v57 = vpop.f32.mrf.mxu3 }
 0x255   :  { %v366_v61 = vpack.c.bf16 %v330_v57, %v330_v57  ;;  %v917_v57 = vunpack.c.l.bf16 %v1210_v54 }
 0x257   :  { %v382_v62 = vunpack.c.l.bf16 %v366_v61 }
 0x259   :  { %v1164_v0 = vmul.f32 %v894_v60, %v382_v62 }
 0x25b   :  { %v428_v1 = vpack.c.bf16 %v1164_v0, %v1160_v63 }
 0x25c   :  { %v333_v2 = vpop.f32.mrf.mxu3 }
 0x25d   :  { %v367_v3 = vpack.c.bf16 %v333_v2, %v333_v2  ;;  %v918_v2 = vunpack.c.h.bf16 %v1210_v54 }
 0x25f   :  { %v383_v7 = vunpack.c.l.bf16 %v367_v3 }
 0x261   :  { %v1177_v11 = vmul.f32 %v897_v6, %v383_v7 }
 0x264   :  { %v335_v5 = vpop.f32.mrf.mxu3 }
 0x265   :  { %v368_v9 = vpack.c.bf16 %v335_v5, %v335_v5 }
 0x267   :  { %v384_v10 = vunpack.c.l.bf16 %v368_v9  ;;  %v1217_v9 = vld [vmem:[%s1418_s13 + $0x30] sm:$0xff]  }
 0x269   :  { %v1181_v13 = vmul.f32 %v898_v8, %v384_v10  ;;  %v914_v10 = vunpack.c.h.bf16 %v1217_v9 }
 0x26b   :  { %v429_v14 = vpack.c.bf16 %v1181_v13, %v1177_v11  ;;  %v1261_v11 = vpop.f32.mrf.mxu0 }
 0x26c   :  { %v338_v16 = vpop.f32.mrf.mxu3  ;;  %v485_v33 = vpack.c.bf16 %v1261_v11, %v1261_v11 }
 0x26d   :  { %v369_v17 = vpack.c.bf16 %v338_v16, %v338_v16 }
 0x26e   :  { %v501_v18 = vunpack.c.l.bf16 %v485_v33 }
 0x26f   :  { %v385_v24 = vunpack.c.l.bf16 %v369_v17 }
 0x271   :  { %v417_v28 = vmul.f32 %v901_v23, %v385_v24  ;;  %v913_v24 = vunpack.c.l.bf16 %v1217_v9 }
 0x273   :  { %v1263_v13 = vpop.f32.mrf.mxu0 }
 0x274   :  { %v340_v22 = vpop.f32.mrf.mxu3 }
 0x275   :  { %v370_v26 = vpack.c.bf16 %v340_v22, %v340_v22 }
 0x277   :  { %v386_v27 = vunpack.c.l.bf16 %v370_v26 }
 0x279   :  { %v418_v29 = vmul.f32 %v902_v25, %v386_v27 }
 0x27b   :  { %v430_v30 = vpack.c.bf16 %v418_v29, %v417_v28 }
 0x27c   :  { %v343_v31 = vpop.f32.mrf.mxu3 }
 0x27d   :  { %v371_v32 = vpack.c.bf16 %v343_v31, %v343_v31 }
 0x27f   :  { %v387_v36 = vunpack.c.l.bf16 %v371_v32 }
 0x281   :  { %v419_v40 = vmul.f32 %v905_v35, %v387_v36  ;;  %v1233_v36 = vld [vmem:[%s1418_s13 + $0x28] sm:$0xff]  }
 0x284   :  { %v345_v34 = vpop.f32.mrf.mxu3 }
 0x285   :  { %v372_v38 = vpack.c.bf16 %v345_v34, %v345_v34 }
 0x287   :  { %v388_v39 = vunpack.c.l.bf16 %v372_v38  ;;  %v910_v38 = vunpack.c.h.bf16 %v1233_v36 }
 0x289   :  { %v420_v41 = vmul.f32 %v906_v37, %v388_v39 }
 0x28b   :  { %v431_v42 = vpack.c.bf16 %v420_v41, %v419_v40  ;;  %v909_v41 = vunpack.c.l.bf16 %v1233_v36 }
 0x28c   :  { %v348_v43 = vpop.f32.mrf.mxu3 }
 0x28d   :  { %v373_v32 = vpack.c.bf16 %v348_v43, %v348_v43 }
 0x294   :  { %v350_v45 = vpop.f32.mrf.mxu3 }
 0x295   :  { %v374_v28 = vpack.c.bf16 %v350_v45, %v350_v45  ;;  %v389_v45 = vunpack.c.l.bf16 %v373_v32  ;;  %v882_v32 = vld [vmem:[%s1420_s14 + $0x18] sm:$0xff] }
 0x297   :  { %v390_v39 = vunpack.c.l.bf16 %v374_v28  ;;  %v884_v28 = vld [vmem:[%s1420_s14 + $0x28] sm:$0xff] }
 0x29c   :  { %v353_v47 = vpop.f32.mrf.mxu3 }
 0x29d   :  { %v375_v5 = vpack.c.bf16 %v353_v47, %v353_v47  ;;  %v422_v47 = vmul.f32 %v910_v38, %v390_v39  ;;  %v881_v39 = vld [vmem:[%s1420_s14 + $0x10] sm:$0xff] }
 0x29f   :  { %v391_v26 = vunpack.c.l.bf16 %v375_v5  ;;  %v886_v5 = vld [vmem:[%s1420_s14 + $0x38] sm:$0xff] }
 0x2a0   :  { %665 = vmatpush.bf16.msrb.mxu2 %v886_v5 }
 0x2a1   :  { %v423_v34 = vmul.f32 %v913_v24, %v391_v26 }
 0x2a4   :  { %v355_v49 = vpop.f32.mrf.mxu3 }
 0x2a5   :  { %v376_v61 = vpack.c.bf16 %v355_v49, %v355_v49  ;;  %v421_v49 = vmul.f32 %v909_v41, %v389_v45  ;;  %v880_v45 = vld [vmem:[%s1420_s14 + $0x8] sm:$0xff] }
 0x2a7   :  { %v392_v16 = vunpack.c.l.bf16 %v376_v61  ;;  %v556_v61 = vsel %vm542_vm2, %v430_v30, 0 }
 0x2a9   :  { %v424_v29 = vmul.f32 %v914_v10, %v392_v16 }
 0x2ab   :  { %v433_v40 = vpack.c.bf16 %v424_v29, %v423_v34 }
 0x2ac   :  { %v358_v50 = vpop.f32.mrf.mxu3 }
 0x2ad   :  { %v377_v55 = vpack.c.bf16 %v358_v50, %v358_v50  ;;  %v565_v43 = vsel %vm542_vm2, %v433_v40, 0  ;;  %v432_v50 = vpack.c.bf16 %v422_v47, %v421_v49  ;;  %v879_v47 = vld [vmem:[%s1420_s14] sm:$0xff] }
 0x2af   :  { %v393_v62 = vunpack.c.l.bf16 %v377_v55  ;;  %v562_v55 = vsel %vm542_vm2, %v432_v50, 0 }
 0x2b1   :  { %v425_v17 = vmul.f32 %v917_v57, %v393_v62  ;;  %v553_v62 = vsel %vm542_vm2, %v429_v14, 0  ;;  %v1265_v14 = vpop.f32.mrf.mxu0 }
 0x2b4   :  { %v360_v59 = vpop.f32.mrf.mxu3 }
 0x2b5   :  { %v378_v3 = vpack.c.bf16 %v360_v59, %v360_v59  ;;  %v559_v59 = vsel %vm542_vm2, %v431_v42, 0  ;;  %v547_v42 = vsel %vm542_vm2, %v427_v53, 0 }
 0x2b7   :  { %v394_v7 = vunpack.c.l.bf16 %v378_v3  ;;  %v550_v3 = vsel %vm542_vm2, %v428_v1, 0 }
 0x2b9   :  { %v426_v22 = vmul.f32 %v918_v2, %v394_v7  ;;  %v1267_v63 = vpop.f32.mrf.mxu0 }
 0x2bb   :  { %v434_v27 = vpack.c.bf16 %v426_v22, %v425_v17  ;;  %v587_v17 = vld [vmem:[%s1419_s16 + $0x8] sm:$0xff] }
 0x2bd   :  { %v568_v31 = vsel %vm542_vm2, %v434_v27, 0  ;;  %v885_v27 = vld [vmem:[%s1420_s14 + $0x30] sm:$0xff] }
 0x2be   :  { %570 = vmatpush.bf16.xpose.msra.mxu1 %v568_v31  ;;  %666 = vmatpush.bf16.msrb.mxu2 %v885_v27  ;;  %v883_v31 = vld [vmem:[%s1420_s14 + $0x20] sm:$0xff] }
 0x2c1   :  { %v1269_v0 = vpop.f32.mrf.mxu0 }
 0x2c2   :  { %667 = vmatpush.bf16.msrb.mxu2 %v884_v28 }
 0x2c6   :  { %571 = vmatpush.bf16.xpose.msra.mxu1 %v565_v43  ;;  %668 = vmatpush.bf16.msrb.mxu2 %v883_v31 }
 0x2c9   :  { %v1271_v1 = vpop.f32.mrf.mxu0 }
 0x2ca   :  { %669 = vmatpush.bf16.msrb.mxu2 %v882_v32 }
 0x2ce   :  { %572 = vmatpush.bf16.xpose.msra.mxu1 %v562_v55  ;;  %670 = vmatpush.bf16.msrb.mxu2 %v881_v39 }
 0x2d1   :  { %v1273_v51 = vpop.f32.mrf.mxu0 }
 0x2d2   :  { %671 = vmatpush.bf16.msrb.mxu2 %v880_v45  ;;  %v488_v45 = vpack.c.bf16 %v1267_v63, %v1267_v63 }
 0x2d6   :  { %573 = vmatpush.bf16.xpose.msra.mxu1 %v559_v59  ;;  %672 = vmatpush.bf16.msrb.mxu2 %v879_v47 }
 0x2d9   :  { %v1275_v52 = vpop.f32.mrf.mxu0 }
 0x2da   :  { %v492_v9 = vpack.c.bf16 %v1275_v52, %v1275_v52  ;;  %v487_v52 = vpack.c.bf16 %v1265_v14, %v1265_v14  ;;  %v504_v14 = vunpack.c.l.bf16 %v488_v45 }
 0x2dc   :  { %v520_v11 = vmul.f32 %v894_v60, %v504_v14 }
 0x2de   :  { %574 = vmatpush.bf16.xpose.msra.mxu1 %v556_v61 }
 0x2e1   :  { %v465_v53 = vpop.f32.mrf.mxu0 }
 0x2e2   :  { %v493_v31 = vpack.c.bf16 %v465_v53, %v465_v53  ;;  %v489_v53 = vpack.c.bf16 %v1269_v0, %v1269_v0 }
 0x2e4   :  { %v505_v47 = vunpack.c.l.bf16 %v489_v53 }
 0x2e6   :  { %575 = vmatpush.bf16.xpose.msra.mxu1 %v553_v62  ;;  %v521_v63 = vmul.f32 %v897_v6, %v505_v47 }
 0x2e9   :  { %v467_v7 = vpop.f32.mrf.mxu0 }
 0x2ea   :  { %v494_v32 = vpack.c.bf16 %v467_v7, %v467_v7 }
 0x2ec   :  { %v510_v54 = vunpack.c.l.bf16 %v494_v32 }
 0x2ee   :  { %576 = vmatpush.bf16.xpose.msra.mxu1 %v550_v3 }
 0x2f1   :  { %v470_v29 = vpop.f32.mrf.mxu0 }
 0x2f2   :  { %v495_v62 = vpack.c.bf16 %v470_v29, %v470_v29 }
 0x2f6   :  { %577 = vmatpush.bf16.xpose.msra.mxu1 %v547_v42 }
 0x2f9   :  { %v472_v34 = vpop.f32.mrf.mxu0 }
 0x2fa   :  { %v496_v42 = vpack.c.bf16 %v472_v34, %v472_v34 }
 0x2fd   :  { %834 = vmatmul.msk.bf16.vlgmr.msra.gmra.mxu1 %vm542_vm2, %v541_v21 }
 0x2fe   :  { %717 = vmatpush.msrb.mxu1 %v695_v44 }
 0x301   :  { %v475_v40 = vpop.f32.mrf.mxu0 }
 0x302   :  { %v497_v55 = vpack.c.bf16 %v475_v40, %v475_v40 }
 0x309   :  { %v477_v43 = vpop.f32.mrf.mxu0 }
 0x30a   :  { %v498_v59 = vpack.c.bf16 %v477_v43, %v477_v43 }
 0x311   :  { %v480_v49 = vpop.f32.mrf.mxu0 }
 0x312   :  { %v499_v50 = vpack.c.bf16 %v480_v49, %v480_v49 }
 0x314   :  { %v515_v61 = vunpack.c.l.bf16 %v499_v50 }
 0x316   :  { %v531_v5 = vmul.f32 %v917_v57, %v515_v61 }
 0x319   :  { %v482_v3 = vpop.f32.mrf.mxu0 }
 0x37a   :  { %v579_v19 = vpop.f32.mrf.mxu1 }
 0x37b   :  { %v584_v21 = vmul.f32 0.57735026, %v579_v19  ;;  %v513_v19 = vunpack.c.l.bf16 %v497_v55 }
 0x37d   :  { %v1280_v30 = vadd.f32 %v586_v20, %v584_v21  ;;  %v514_v20 = vunpack.c.l.bf16 %v498_v59  ;;  %v500_v21 = vpack.c.bf16 %v482_v3, %v482_v3  ;;  %v529_v27 = vmul.f32 %v913_v24, %v513_v19 }
 0x37e   :  { %v491_v24 = vpack.c.bf16 %v1273_v51, %v1273_v51  ;;  %v526_v51 = vmul.f32 %v906_v37, %v510_v54  ;;  %v503_v37 = vunpack.c.l.bf16 %v487_v52 }
 0x37f   :  { %590 = vmax.xlane.f32.xlu0 %v1280_v30  ;;  %v530_v28 = vmul.f32 %v914_v10, %v514_v20  ;;  %v509_v10 = vunpack.c.l.bf16 %v493_v31  ;;  %v731_v20 = vld [vmem:[%s1422_s10 + $0x20] sm:$0xff] }
 0x380   :  { %v507_v36 = vunpack.c.l.bf16 %v491_v24  ;;  %v519_v55 = vmul.f32 %v893_v58, %v503_v37  ;;  %v930_v24 = vld [vmem:[%s1423_s11] ss:$0 sm:$0xff] }
 0x381   :  { %v539_v40 = vpack.c.bf16 %v530_v28, %v529_v27  ;;  %v525_v7 = vmul.f32 %v905_v35, %v509_v10  ;;  %v486_v35 = vpack.c.bf16 %v1263_v13, %v1263_v13  ;;  %v517_v13 = vmul.f32 %v889_v46, %v501_v18  ;;  %v728_v28 = vld [vmem:[%s1422_s10 + $0x8] sm:$0xff] }
 0x382   :  { %v581_v16 = vpop.f32.mrf.mxu1  ;;  %v534_v4 = vpack.c.bf16 %v520_v11, %v519_v55 }
 0x383   :  { %v585_v22 = vmul.f32 0.57735026, %v581_v16  ;;  %v516_v16 = vunpack.c.l.bf16 %v500_v21  ;;  %v537_v49 = vpack.c.bf16 %v526_v51, %v525_v7  ;;  %v730_v21 = vld [vmem:[%s1422_s10 + $0x18] sm:$0xff] }
 0x385   :  { %v1289_v26 = vadd.f32 %v587_v17, %v585_v22  ;;  %v511_v17 = vunpack.c.l.bf16 %v495_v62  ;;  %v512_v22 = vunpack.c.l.bf16 %v496_v42  ;;  %v532_v29 = vmul.f32 %v918_v2, %v516_v16  ;;  %v729_v16 = vld [vmem:[%s1422_s10 + $0x10] sm:$0xff] }
 0x387   :  { %592 = vmax.xlane.f32.xlu0 %v1289_v26  ;;  %v540_v34 = vpack.c.bf16 %v532_v29, %v531_v5  ;;  %v527_v39 = vmul.f32 %v909_v41, %v511_v17  ;;  %v528_v57 = vmul.f32 %v910_v38, %v512_v22  ;;  %v490_v41 = vpack.c.bf16 %v1271_v1, %v1271_v1  ;;  %v727_v29 = vld [vmem:[%s1422_s10] sm:$0xff] }
 0x388   :  { %v508_v38 = vunpack.c.l.bf16 %v492_v9  ;;  %v523_v1 = vmul.f32 %v901_v23, %v507_v36 }
 0x389   :  { %679 = vmatpush.bf16.msra.mxu2 %v540_v34  ;;  %v538_v2 = vpack.c.bf16 %v528_v57, %v527_v39  ;;  %v506_v0 = vunpack.c.l.bf16 %v490_v41 }
 0x38a   :  { %v524_v43 = vmul.f32 %v902_v25, %v508_v38  ;;  %v502_v25 = vunpack.c.l.bf16 %v486_v35 }
 0x38b   :  { %v522_v50 = vmul.f32 %v898_v8, %v506_v0 }
 0x38c   :  { %v536_v23 = vpack.c.bf16 %v524_v43, %v523_v1  ;;  %v518_v6 = vmul.f32 %v890_v48, %v502_v25  ;;  %v734_v48 = vld [vmem:[%s1422_s10 + $0x38] sm:$0xff] }
 0x38d   :  { %680 = vmatpush.bf16.msra.mxu2 %v539_v40  ;;  %v535_v59 = vpack.c.bf16 %v522_v50, %v521_v63 }
 0x38e   :  { %v533_v8 = vpack.c.bf16 %v518_v6, %v517_v13 }
 0x391   :  { %681 = vmatpush.bf16.msra.mxu2 %v538_v2 }
 0x395   :  { %682 = vmatpush.bf16.msra.mxu2 %v537_v49 }
 0x399   :  { %683 = vmatpush.bf16.msra.mxu2 %v536_v23 }
 0x39d   :  { %684 = vmatpush.bf16.msra.mxu2 %v535_v59 }
 0x3a1   :  { %685 = vmatpush.bf16.msra.mxu2 %v534_v4 }
 0x3a5   :  { %686 = vmatpush.bf16.msra.mxu2 %v533_v8 }
 0x3f2   :  { %v591_v61 = vpop.xlane.xlu0 %590 }
 0x3f3   :  { %v594_v62 = vsub.f32 %v1280_v30, %v591_v61  ;;  %v733_v30 = vld [vmem:[%s1422_s10 + $0x30] sm:$0xff] }
 0x3f5   :  { %v596_v3 = vmul.f32 1.442695, %v594_v62 }
 0x3f7   :  { %931 = vpow2.f32 %v596_v3 }
 0x3fa   :  { %v593_v58 = vpop.xlane.xlu0 %592 }
 0x3fb   :  { %v595_v56 = vsub.f32 %v1289_v26, %v593_v58  ;;  %v732_v26 = vld [vmem:[%s1422_s10 + $0x28] sm:$0xff] }
 0x3fd   :  { %v598_v60 = vmul.f32 1.442695, %v595_v56  ;;  %v932_v42 = vpop.eup %931 }
 0x3ff   :  { %933 = vpow2.f32 %v598_v60 }
 0x405   :  { %v934_v19 = vpop.eup %933 }
 0x406   :  { %v600_v46 = vpack.c.bf16 %v934_v19, %v932_v42 }
 0x408   :  { %673 = vmatmul.bf16.vlgmr.msrb.gmra.mxu2 %v600_v46 }
 0x409   :  { %753 = vmatpush.msrb.mxu2 %v734_v48 }
 0x40b   :  { %754 = vmatpush.msrb.mxu2 %v733_v30 }
 0x40d   :  { %755 = vmatpush.msrb.mxu2 %v732_v26 }
 0x40f   :  { %756 = vmatpush.msrb.mxu2 %v731_v20 }
 0x411   :  { %757 = vmatpush.msrb.mxu2 %v730_v21 }
 0x413   :  { %758 = vmatpush.msrb.mxu2 %v729_v16 }
 0x415   :  { %759 = vmatpush.msrb.mxu2 %v728_v28 }
 0x417   :  { %760 = vmatpush.msrb.mxu2 %v727_v29 }
 0x418   :  { %687 = vmatmul.bf16.vlgmr.msra.gmra.mxu2 %v600_v46 }
 0x48b   :  { %v674_v5 = vpop.f32.mrf.mxu2 }
 0x48c   :  { %935 = vrcp.f32 %v674_v5 }
 0x492   :  { %v936_v17 = vpop.eup %935 }
 0x493   :  { %v676_v22 = vpop.f32.mrf.mxu2  ;;  %867 = vmatmul.msk.f32.vlgmr.msrb.gmra.mxu1 %vm131_vm1, %v936_v17 }
 0x494   :  { %937 = vrcp.f32 %v676_v22 }
 0x49a   :  { %v938_v27 = vpop.eup %937 }
 0x49b   :  { %868 = vmatmul.msk.f32.gmra.mxu1 %vm131_vm1, %v938_v27  ;;  %v688_v31 = vpop.f32.mrf.mxu2 }
 0x4a3   :  { %v690_v39 = vpop.f32.mrf.mxu2 }
 0x510   :  { %v719_v32 = vpop.f32.mrf.mxu1 }
 0x511   :  { %v725_v34 = vmul.f32 %v719_v32, %v688_v31 }
 0x513   :  { %869 = vmatmul.msk.f32.vlgmr.msrb.gmra.mxu2 %vm542_vm2, %v725_v34 }
 0x518   :  { %v722_v57 = vpop.f32.mrf.mxu1 }
 0x519   :  { %v726_v40 = vmul.f32 %v722_v57, %v690_v39 }
 0x51b   :  { %870 = vmatmul.msk.f32.gmra.mxu2 %vm542_vm2, %v726_v40 }
 0x596   :  { %v762_v9 = vpop.f32.mrf.mxu2 }
 0x597   :  { %v763_v10 = vadd.f32 %v930_v24, %v762_v9 }
 0x599   :  { %v768_v54 = vmul.f32 %v763_v10, %v1060_v12 }
 0x59b   :  { %770 = vst.msk [vmem:[%s1424_s17] sm:$0xff] %vm131_vm1, %v768_v54 }
 0x59e   :  { %v765_v2 = vpop.f32.mrf.mxu2 }
 0x59f   :  { %v766_v53 = vadd.f32 %v930_v24, %v765_v2 }
 0x5a1   :  { %v769_v41 = vmul.f32 %v766_v53, %v1067_v15 }
 0x5a3   :  { %771 = vst.msk [vmem:[%s1424_s17 + $0x8] sm:$0xff] %vm131_vm1, %v769_v41 }

</bundles_post_ra>
